<compile_context>
chip_gen: v6e
topology: v6e:2x2x1
jax: 0.10.0
libtpu: 0.0.40
codegen_flags: <defaults>
</compile_context>

<pallas_src>
import functools

import jax
import jax.numpy as jnp
from jax.experimental import pallas as pl
from jax.experimental.pallas import tpu as pltpu

_LANE_CHOICES = (1024, 512, 256, 128)   # lane-dense candidates (multiples of 128)
_MAX_BLOCK_ELEMS = 512 * 1024           # <= 2 MiB f32 per block


def _dropsample_kernel(keep_ref, x_ref, o_ref, *, inv_keep):
    """o = x * keep[b] * (1/(1-prob)).  keep_ref lives in SMEM (scalar prefetch)."""
    b = pl.program_id(0)
    scale = keep_ref[b].astype(jnp.float32) * inv_keep
    o_ref[...] = (x_ref[...].astype(jnp.float32) * scale).astype(o_ref.dtype)


def _round_up(v, m):
    return ((v + m - 1) // m) * m


@functools.partial(jax.jit, static_argnames=("prob", "training"))
def dropsample(x, key, *, prob=0.0, training=True):
    """JAX/Pallas equivalent of Dropsample.forward (x: (B, ...), mask per sample)."""
    if prob == 0.0 or not training:
        return x  # identity path, exactly like the PyTorch module

    B = x.shape[0]
    orig_shape = x.shape
    n = 1
    for d in orig_shape[1:]:
        n *= int(d)

    # Per-sample keep decision: uniform(0,1) per sample, keep if > prob.
    u = jax.random.uniform(key, (B,), jnp.float32)
    keep = (u > prob).astype(jnp.int32)

    # --- choose a lane-dense layout that avoids padding when possible --------
    lane = next((L for L in _LANE_CHOICES if n % L == 0), 512)
    R = -(-n // lane)                                  # ceil(n / lane)

    max_rows = max((_MAX_BLOCK_ELEMS // lane) // 8 * 8, 8)
    if R <= max_rows:
        TR = R                                         # full-extent block (allowed)
        R_pad = R
    else:
        TR = max_rows                                  # multiple of 8
        R_pad = _round_up(R, TR)
    n_pad = R_pad * lane

    xf = x.reshape(B, n)
    if n_pad != n:
        xf = jnp.pad(xf, ((0, 0), (0, n_pad - n)))
    x3 = xf.reshape(B, R_pad, lane)

    out = pl.pallas_call(
        functools.partial(_dropsample_kernel, inv_keep=1.0 / (1.0 - prob)),
        grid_spec=pltpu.PrefetchScalarGridSpec(
            num_scalar_prefetch=1,
            grid=(B, R_pad // TR),
            in_specs=[pl.BlockSpec((None, TR, lane),
                                   lambda b, r, keep: (b, r, 0))],
            out_specs=pl.BlockSpec((None, TR, lane),
                                   lambda b, r, keep: (b, r, 0)),
        ),
        out_shape=jax.ShapeDtypeStruct((B, R_pad, lane), x.dtype),
        compiler_params=pltpu.CompilerParams(
            dimension_semantics=("parallel", "parallel")),
    )(keep, x3)

    out = out.reshape(B, n_pad)
    if n_pad != n:
        out = out[:, :n]
    return out.reshape(orig_shape)


# ----------------------------------------------------------------------------
if __name__ == "__main__":
    key = jax.random.PRNGKey(0)
    k_x, k_mask = jax.random.split(key)

    # Small shapes consistent with the module's 5-D (B, C, S, H, W) usage.
    B, C, S, H, W = 2, 4, 8, 16, 16
    x = jax.random.normal(k_x, (B, C, S, H, W), jnp.float32)
    prob = 0.35

    # Training path (Pallas kernel).
    y = jax.block_until_ready(dropsample(x, k_mask, prob=prob, training=True))

    # Pure-JAX reference of the same semantics (same per-sample draws).
    u = jax.random.uniform(k_mask, (B,), jnp.float32)
    keep_ref = (u > prob).astype(jnp.float32).reshape(B, 1, 1, 1, 1)
    y_ref = x * keep_ref / (1.0 - prob)

    assert y.shape == x.shape, (y.shape, x.shape)
    assert bool(jnp.all(jnp.isfinite(y)))
    assert bool(jnp.allclose(y, y_ref, atol=1e-6, rtol=1e-6))

    # Identity paths (prob == 0, or eval mode) must return x unchanged.
    y_id0 = jax.block_until_ready(dropsample(x, k_mask, prob=0.0, training=True))
    y_id1 = jax.block_until_ready(dropsample(x, k_mask, prob=prob, training=False))
    assert bool(jnp.array_equal(y_id0, x))
    assert bool(jnp.array_equal(y_id1, x))

    print("KERNEL_OK")
</pallas_src>

<mosaic_0001>
module attributes {stable_mosaic.version = 11 : i64} {
  func.func @_dropsample_kernel(%arg0: i32, %arg1: i32, %arg2: memref<2xi32, #tpu.memory_space<smem>>, %arg3: memref<1x8x1024xf32, #tpu.memory_space<vmem>>, %arg4: memref<1x8x1024xf32, #tpu.memory_space<vmem>>) attributes {dimension_semantics = [#tpu.dimension_semantics<parallel>, #tpu.dimension_semantics<parallel>], iteration_bounds = array<i64: 2, 1>, scalar_prefetch = 1 : i64, scratch_operands = 0 : i64, tpu.core_type = #tpu.core_type<tc>, window_params = [{transform_indices = @transform_0, window_bounds = array<i64: 1, 8, 1024>}, {transform_indices = @transform_1, window_bounds = array<i64: 1, 8, 1024>}]} {
    %0 = arith.index_cast %arg0 : i32 to index
    %1 = memref.load %arg2[%0] : memref<2xi32, #tpu.memory_space<smem>>
    %2 = arith.sitofp %1 : i32 to f32
    %cst = arith.constant 1.53846157 : f32
    %3 = arith.mulf %2, %cst : f32
    %c0 = arith.constant 0 : index
    %c0_0 = arith.constant 0 : index
    %c0_1 = arith.constant 0 : index
    %4 = vector.load %arg3[%c0, %c0_0, %c0_1] : memref<1x8x1024xf32, #tpu.memory_space<vmem>>, vector<1x8x1024xf32>
    %5 = vector.shape_cast %4 : vector<1x8x1024xf32> to vector<8x1024xf32>
    %6 = vector.broadcast %3 : f32 to vector<8x1024xf32>
    %7 = arith.mulf %5, %6 : vector<8x1024xf32>
    %c0_2 = arith.constant 0 : index
    %c0_3 = arith.constant 0 : index
    %c0_4 = arith.constant 0 : index
    %8 = vector.load %arg4[%c0_2, %c0_3, %c0_4] : memref<1x8x1024xf32, #tpu.memory_space<vmem>>, vector<1x8x1024xf32>
    %9 = vector.shape_cast %8 : vector<1x8x1024xf32> to vector<8x1024xf32>
    %10 = vector.shape_cast %7 : vector<8x1024xf32> to vector<1x8x1024xf32>
    tpu.vector_store %arg4[%c0_2, %c0_3, %c0_4], %10 {strides = array<i32>} : memref<1x8x1024xf32, #tpu.memory_space<vmem>>, vector<1x8x1024xf32>,
    return
  }
  func.func @transform_0(%arg0: i32, %arg1: i32, %arg2: memref<2xi32, #tpu.memory_space<smem>>) -> (i32, i32, i32) {
    %c0_i32 = arith.constant 0 : i32
    %c0_i32_0 = arith.constant 0 : i32
    return %arg0, %arg1, %c0_i32 : i32, i32, i32
  }
  func.func @transform_1(%arg0: i32, %arg1: i32, %arg2: memref<2xi32, #tpu.memory_space<smem>>) -> (i32, i32, i32) {
    %c0_i32 = arith.constant 0 : i32
    %c0_i32_0 = arith.constant 0 : i32
    return %arg0, %arg1, %c0_i32 : i32, i32, i32
  }
}

</mosaic_0001>

<bundles_post_ra>
// kernel: dropsample.1
= control target key start
LH: loop header
LB: loop body
LE: loop exit
PB: predicated region body
PF: predicated region fallthrough
CT: control target
= control target key end

     0   :  { %s408_s0 = inlined_call_operand.vmem [shape: s32[2], index: 0, kind: input, shape index: {}]   ;;  %s409_s1 = inlined_call_operand.vmem [shape: f32[2,8,1024], index: 1, kind: input, shape index: {}]   ;;  %s410_s2 = inlined_call_operand.vmem [shape: f32[2,8,1024], index: 2, kind: output, shape index: {}]  }
   0x1   :  { %s7_s11 = sshll.u32 %s408_s0, 4  ;;  %s8_s11 = int_to_ptr.vmem [resolvable:$true] %s7_s11 }
   0x2   :  { %s318_s12 = scalar_lea.vmem %s8_s11, 16  ;;  %p323_p1 = scmp.lt.s32.totalorder %s8_s11, %s8_s11 }
   0x3   :  { %p319_p0 = scmp.ne.s32.totalorder %s8_s11, %s318_s12  ;;  %p324_p2 = scmp.lt.s32.totalorder %s318_s12, %s318_s12 }
   0x5   :  { %p325_p3 = por %p324_p2, %p323_p1 }
   0x7   :  { %p326_p4 = pnand %p325_p3, %p319_p0 }
   0x9   :  { %329 = shalt.err (!%p326_p4)  }
   0xa   :  { %s356_s13 = smov [#allocation3]  }
   0xb   :  { %10 = dma.vmem_to_smem %s8_s11, 16, %s356_s13, [#allocation2] }
   0xc   :  { %342 = dma.done.wait [#allocation2], 16 }
   0xd   :  { %343 = vsyncadd [#allocation2], 4294967280 }
   0xe   :  { %12 = sfence }
   0xf   :  { %s375_s14 = smov 0   ;;  %s377_s15 = smov 0  }
  0x10   :  { %s379_s16 = smov 0  }
  0x11 LB: > { %s30_s0 = sadd.s32 1, %s350_s15  ;;  %p284_p5 = scmp.ge.s32.totalorder %s354_s16, 1  ;;  %s354_s16 = sphi %s379_s16, %s18_s16   ;;  %s350_s15 = sphi %s377_s15, %s412_s15   ;;  %s346_s14 = sphi %s375_s14, %s411_s14  }
  0x12   : > { %p32_p6 = scmp.ge.s32.totalorder %s30_s0, 2  ;;  %p114_p7 = scmp.lt.s32.totalorder %s354_s16, 3 }
  0x14   : > { %s414_s0 = smov (%p32_p6, %s30_s0), 0  ;;  %p115_p8 = pnand %p284_p5, %p114_p7 }
  0x15   : > { %p142_p9 = scmp.lt.s32.totalorder (!%p115_p8), %s346_s14, 1  ;;  %s160_s17 = sld [smem:[#allocation3 + %s346_s14]] (!%p115_p8) }
  0x16   : > { %118 = sbr.rel (%p115_p8) target bundleno = 38 (0x26), region = 24 }
  0x1b   : > { %s416_s14 = smov (!%p142_p9, %s346_s14), 1  ;;  %s161_s22 = scvt.s32.f32 %s160_s17 }
  0x1c   : > { %s291_s18 = sshll.u32 %s416_s14, 6 }
  0x1d   : > { %s150_s21 = scalar_lea.vmem %s409_s1, %s291_s18  ;;  %s162_s23 = smul.f32 1.5384616, %s161_s22 }
  0x1e   : > { %v163_v0 = vld [vmem:[%s150_s21] sm:$0xff]  ;;  %v164_v1 = vld [vmem:[%s150_s21 + $0x8] sm:$0xff]  ;;  %v165_v2 = vld [vmem:[%s150_s21 + $0x10] sm:$0xff]  ;;  %s159_s26 = scalar_lea.vmem %s410_s2, %s291_s18 }
  0x1f   : > { %v166_v3 = vld [vmem:[%s150_s21 + $0x18] sm:$0xff]  ;;  %v167_v4 = vld [vmem:[%s150_s21 + $0x20] sm:$0xff]  ;;  %v168_v5 = vld [vmem:[%s150_s21 + $0x28] sm:$0xff]  ;;  %v171_v8 = vstv %s162_s23 }
  0x20   : > { %v169_v6 = vld [vmem:[%s150_s21 + $0x30] sm:$0xff]  ;;  %v170_v7 = vld [vmem:[%s150_s21 + $0x38] sm:$0xff]  ;;  %v172_v9 = vmul.f32 %v171_v8, %v163_v0  ;;  %v173_v10 = vmul.f32 %v171_v8, %v164_v1  ;;  %v174_v11 = vmul.f32 %v171_v8, %v165_v2  ;;  %v175_v12 = vmul.f32 %v171_v8, %v166_v3 }
  0x21   : > { %v176_v13 = vmul.f32 %v171_v8, %v167_v4  ;;  %v177_v14 = vmul.f32 %v171_v8, %v168_v5  ;;  %v178_v15 = vmul.f32 %v171_v8, %v169_v6  ;;  %v179_v16 = vmul.f32 %v171_v8, %v170_v7 }
  0x22   : > { %180 = vst [vmem:[%s159_s26] sm:$0xff] %v172_v9  ;;  %181 = vst [vmem:[%s159_s26 + $0x8] sm:$0xff] %v173_v10 }
  0x23   : > { %182 = vst [vmem:[%s159_s26 + $0x10] sm:$0xff] %v174_v11  ;;  %183 = vst [vmem:[%s159_s26 + $0x18] sm:$0xff] %v175_v12 }
  0x24   : > { %184 = vst [vmem:[%s159_s26 + $0x20] sm:$0xff] %v176_v13  ;;  %185 = vst [vmem:[%s159_s26 + $0x28] sm:$0xff] %v177_v14 }
  0x25   : > { %186 = vst [vmem:[%s159_s26 + $0x30] sm:$0xff] %v178_v15  ;;  %187 = vst [vmem:[%s159_s26 + $0x38] sm:$0xff] %v179_v16 }
  0x26 PF: > { %s18_s16 = sadd.s32 1, %s354_s16   ;;  %s411_s14 = smov %s350_s15 }
  0x27   : > { %p15_p10 = scmp.ge.s32.totalorder %s18_s16, 4   ;;  %s412_s15 = smov %s414_s0 }
  0x29   :  { %17 = sbr.rel (!%p15_p10) target bundleno = 17 (0x11), region = 54 }

</bundles_post_ra>
